<compile_context>
chip_gen: v7x
topology: tpu7x:2x2x1
jax: 0.10.0
libtpu: 0.0.40
codegen_flags: <defaults>
</compile_context>

<pallas_src>
import numpy as np
import jax
import jax.numpy as jnp
from jax.experimental import pallas as pl
from jax.experimental.pallas import tpu as pltpu

PATCH = 4  # 4x4 patch embed


# ----------------------------------------------------------------------------
# Tiling helpers (no padding: tiles always divide the array extents exactly).
# ----------------------------------------------------------------------------
def _pick_batch_tile(B):
    # Divides B exactly and keeps >= 2 batch tiles whenever B >= 2 (v7x megacore sharding).
    cap = max(1, min(8, B // 2)) if B >= 2 else 1
    for t in range(cap, 0, -1):
        if B % t == 0:
            return t
    return 1


def _pick_row_tile(H, C, W, TB, budget_bytes=6 * 1024 * 1024):
    # Multiple of 8 (f32 sublane tile, and of the patch stride) that divides H,
    # sized so one stream block stays under ~6 MiB per grid step.
    best = 8
    t = 8
    while t <= H:
        if H % t == 0 and TB * C * t * W * 4 <= budget_bytes:
            best = t
        t += 8
    return best


# ----------------------------------------------------------------------------
# Fused pooling kernel: both image streams, grid = (batch tiles, row tiles).
# Output blocks (revisited across the "arbitrary" row axis) are the f32 accumulators.
# ----------------------------------------------------------------------------
def _pooling_kernel(x_ref, xf_ref, lsel_ref, csel_ref, oi_ref, of_ref):
    p = pl.program_id(1)

    @pl.when(p == 0)
    def _():
        oi_ref[...] = jnp.zeros_like(oi_ref)
        of_ref[...] = jnp.zeros_like(of_ref)

    lsel = lsel_ref[...]   # (TB*GPB, TB*C*TH) 0/1 selector: groups rows by (b, c, h % 4)
    csel = csel_ref[...]   # (W, 4)            0/1 selector: groups lanes by (w % 4)

    def pooled_partial(ref):
        tb, c, th, w = ref.shape
        # Collapse leading dims onto sublanes (layout-preserving: th % 8 == 0, lanes unchanged).
        x2 = ref[...].reshape(tb * c * th, w)
        cs = jnp.dot(x2, csel, preferred_element_type=jnp.float32)     # (M, 4)
        return jnp.dot(lsel, cs, preferred_element_type=jnp.float32)   # (TB*GPB, 4)

    oi_ref[...] += pooled_partial(x_ref)
    of_ref[...] += pooled_partial(xf_ref)


def _pooled_sums(x, x_face, TB, TH, GPB):
    B, C, H, W = x.shape
    M = TB * C * TH
    G = TB * GPB

    # 0/1 selectors, built once at trace time (constants).
    lsel = np.zeros((G, M), np.float32)
    for b in range(TB):
        for c in range(C):
            for r in range(TH):
                lsel[b * GPB + c * PATCH + (r % PATCH), (b * C + c) * TH + r] = 1.0
    csel = np.zeros((W, PATCH), np.float32)
    csel[np.arange(W), np.arange(W) % PATCH] = 1.0

    grid = (B // TB, H // TH)
    stream_spec = pl.BlockSpec((TB, C, TH, W), lambda i, p: (i, 0, p, 0))
    const_spec = lambda i, p: (0, 0)
    out_spec = pl.BlockSpec((TB * GPB, PATCH), lambda i, p: (i, 0))

    return pl.pallas_call(
        _pooling_kernel,
        out_shape=(jax.ShapeDtypeStruct((B * GPB, PATCH), jnp.float32),
                   jax.ShapeDtypeStruct((B * GPB, PATCH), jnp.float32)),
        grid_spec=pltpu.PrefetchScalarGridSpec(
            num_scalar_prefetch=0,
            grid=grid,
            in_specs=[stream_spec,                      # raw NCHW image stream
                      stream_spec,                      # raw NCHW face stream
                      pl.BlockSpec((G, M), const_spec),  # row/channel selector (resident)
                      pl.BlockSpec((W, PATCH), const_spec)],  # column selector (resident)
            out_specs=(out_spec, out_spec),
        ),
        compiler_params=pltpu.CompilerParams(
            dimension_semantics=("parallel", "arbitrary"),
            vmem_limit_bytes=48 * 1024 * 1024,
        ),
    )(x, x_face, jnp.asarray(lsel), jnp.asarray(csel))


# ----------------------------------------------------------------------------
# Full PIQ_model forward: Pallas kernel for the image-sized work, tiny head in XLA.
# ----------------------------------------------------------------------------
def piq_model_forward(params, x, x_face, x_feature):
    assert x.shape == x_face.shape and x.shape[0] == x_feature.shape[0]
    B, C, H, W = x.shape
    assert H % 8 == 0, "height must be a multiple of 8 (sublane tile / 4x4 patches)"
    assert W % PATCH == 0, "width must be a multiple of the 4x4 patch size"

    x = x.astype(jnp.float32)
    x_face = x_face.astype(jnp.float32)

    TB = _pick_batch_tile(B)
    TH = _pick_row_tile(H, C, W, TB)
    C_pad = C + (C % 2)            # keeps TB*GPB a multiple of 8 for the output block
    GPB = C_pad * PATCH            # row-groups per sample: (padded channel, h % 4)

    pooled_img, pooled_face = _pooled_sums(x, x_face, TB, TH, GPB)   # (B*GPB, 4) each

    n_patches = (H // PATCH) * (W // PATCH)
    feat_dim = C * PATCH * PATCH   # 48

    def backbone_feats(pooled, w, b):
        # (B*GPB, 4) -> (B, GPB*4); first feat_dim columns are ordered (c, h%4, w%4),
        # matching the reference patch-flattening order; trailing columns are the zero pad.
        v = pooled.reshape(B, GPB * PATCH)[:, :feat_dim] / float(n_patches)
        return v @ w + b

    f_img = backbone_feats(pooled_img, params["bb_w"], params["bb_b"])
    f_face = backbone_feats(pooled_face, params["bbf_w"], params["bbf_b"])

    # Quality head in plain XLA (negligible FLOPs/bytes; Dropout(0.1) is identity in eval).
    z = jnp.concatenate([f_img, f_face, x_feature.astype(jnp.float32)], axis=1)
    h = jnp.maximum(z @ params["q_w1"] + params["q_b1"], 0.0)
    return h @ params["q_w2"] + params["q_b2"]


# ----------------------------------------------------------------------------
# Pure-JAX reference (same math, f32 throughout) for a sanity check.
# ----------------------------------------------------------------------------
def piq_reference(params, x, x_face, x_feature):
    def feats(img, w, b):
        B, C, H, W = img.shape
        t = img.reshape(B, C, H // PATCH, PATCH, W // PATCH, PATCH)
        t = jnp.transpose(t, (0, 2, 4, 1, 3, 5)).reshape(B, -1, C * PATCH * PATCH)
        return jnp.mean(t, axis=1) @ w + b

    f1 = feats(x, params["bb_w"], params["bb_b"])
    f2 = feats(x_face, params["bbf_w"], params["bbf_b"])
    z = jnp.concatenate([f1, f2, x_feature], axis=1)
    h = jnp.maximum(z @ params["q_w1"] + params["q_b1"], 0.0)
    return h @ params["q_w2"] + params["q_b2"]


def init_params(key, patch_dim, feat_dim=1024, extra_dim=495, mid=128):
    ks = jax.random.split(key, 6)
    in_dim = feat_dim + feat_dim + extra_dim  # 1024 + 1024 + 495 = 2543
    return {
        "bb_w": 0.02 * jax.random.normal(ks[0], (patch_dim, feat_dim), jnp.float32),
        "bb_b": jnp.zeros((1, feat_dim), jnp.float32),
        "bbf_w": 0.02 * jax.random.normal(ks[1], (patch_dim, feat_dim), jnp.float32),
        "bbf_b": jnp.zeros((1, feat_dim), jnp.float32),
        "q_w1": 0.02 * jax.random.normal(ks[2], (in_dim, mid), jnp.float32),
        "q_b1": 0.01 * jax.random.normal(ks[3], (1, mid), jnp.float32),
        "q_w2": 0.02 * jax.random.normal(ks[4], (mid, 1), jnp.float32),
        "q_b2": 0.01 * jax.random.normal(ks[5], (1, 1), jnp.float32),
    }


if __name__ == "__main__":
    key = jax.random.PRNGKey(0)
    k_x, k_xf, k_feat, k_p = jax.random.split(key, 4)

    B, C, H, W = 2, 3, 32, 32          # small stand-in for 3x384x384 inputs
    patch_dim = C * PATCH * PATCH       # 48

    x = jax.random.normal(k_x, (B, C, H, W), jnp.float32)
    x_face = jax.random.normal(k_xf, (B, C, H, W), jnp.float32)
    x_feature = jax.random.normal(k_feat, (B, 495), jnp.float32)

    params = init_params(k_p, patch_dim)

    out = jax.jit(piq_model_forward)(params, x, x_face, x_feature)
    out = jax.block_until_ready(out)
    assert out.shape == (B, 1), out.shape
    assert bool(jnp.all(jnp.isfinite(out)))

    ref = piq_reference(params, x, x_face, x_feature)
    assert jnp.allclose(out, ref, atol=2e-2, rtol=2e-2), (out, ref)

    print("KERNEL_OK")
</pallas_src>

<mosaic_0001>
module attributes {stable_mosaic.version = 11 : i64} {
  func.func @_pooling_kernel(%arg0: i32, %arg1: i32, %arg2: memref<1x3x32x32xf32, #tpu.memory_space<vmem>>, %arg3: memref<1x3x32x32xf32, #tpu.memory_space<vmem>>, %arg4: memref<16x96xf32, #tpu.memory_space<vmem>>, %arg5: memref<32x4xf32, #tpu.memory_space<vmem>>, %arg6: memref<16x4xf32, #tpu.memory_space<vmem>>, %arg7: memref<16x4xf32, #tpu.memory_space<vmem>>) attributes {dimension_semantics = [#tpu.dimension_semantics<parallel>, #tpu.dimension_semantics<arbitrary>], iteration_bounds = array<i64: 2, 1>, scalar_prefetch = 0 : i64, scratch_operands = 0 : i64, tpu.core_type = #tpu.core_type<tc>, window_params = [{transform_indices = @transform_0, window_bounds = array<i64: 1, 3, 32, 32>}, {transform_indices = @transform_1, window_bounds = array<i64: 1, 3, 32, 32>}, {pipeline_mode = #tpu.pipeline_mode<synchronous>, transform_indices = @transform_2, window_bounds = array<i64: 16, 96>}, {pipeline_mode = #tpu.pipeline_mode<synchronous>, transform_indices = @transform_3, window_bounds = array<i64: 32, 4>}, {transform_indices = @transform_4, window_bounds = array<i64: 16, 4>}, {transform_indices = @transform_5, window_bounds = array<i64: 16, 4>}]} {
    %c0_i32 = arith.constant 0 : i32
    %0 = arith.cmpi eq, %arg1, %c0_i32 : i32
    %1 = arith.extui %0 : i1 to i32
    %c0_i32_0 = arith.constant 0 : i32
    %2 = arith.cmpi ne, %1, %c0_i32_0 : i32
    scf.if %2 {
      %cst_23 = arith.constant 0.000000e+00 : f32
      %19 = vector.broadcast %cst_23 : f32 to vector<16x4xf32>
      %c0_24 = arith.constant 0 : index
      %c0_25 = arith.constant 0 : index
      %20 = vector.load %arg6[%c0_24, %c0_25] : memref<16x4xf32, #tpu.memory_space<vmem>>, vector<16x4xf32>
      tpu.vector_store %arg6[%c0_24, %c0_25], %19 {strides = array<i32>} : memref<16x4xf32, #tpu.memory_space<vmem>>, vector<16x4xf32>,
      %cst_26 = arith.constant 0.000000e+00 : f32
      %21 = vector.broadcast %cst_26 : f32 to vector<16x4xf32>
      %c0_27 = arith.constant 0 : index
      %c0_28 = arith.constant 0 : index
      %22 = vector.load %arg7[%c0_27, %c0_28] : memref<16x4xf32, #tpu.memory_space<vmem>>, vector<16x4xf32>
      tpu.vector_store %arg7[%c0_27, %c0_28], %21 {strides = array<i32>} : memref<16x4xf32, #tpu.memory_space<vmem>>, vector<16x4xf32>,
    } else {
    }
    %c0 = arith.constant 0 : index
    %c0_1 = arith.constant 0 : index
    %3 = vector.load %arg4[%c0, %c0_1] : memref<16x96xf32, #tpu.memory_space<vmem>>, vector<16x96xf32>
    %c0_2 = arith.constant 0 : index
    %c0_3 = arith.constant 0 : index
    %4 = vector.load %arg5[%c0_2, %c0_3] : memref<32x4xf32, #tpu.memory_space<vmem>>, vector<32x4xf32>
    %c0_4 = arith.constant 0 : index
    %c0_5 = arith.constant 0 : index
    %5 = vector.load %arg6[%c0_4, %c0_5] : memref<16x4xf32, #tpu.memory_space<vmem>>, vector<16x4xf32>
    %c0_6 = arith.constant 0 : index
    %c0_7 = arith.constant 0 : index
    %c0_8 = arith.constant 0 : index
    %c0_9 = arith.constant 0 : index
    %6 = vector.load %arg2[%c0_6, %c0_7, %c0_8, %c0_9] : memref<1x3x32x32xf32, #tpu.memory_space<vmem>>, vector<1x3x32x32xf32>
    %7 = vector.shape_cast %6 : vector<1x3x32x32xf32> to vector<96x32xf32>
    %cst = arith.constant dense<0.000000e+00> : vector<96x4xf32>
    %8 = tpu.matmul %7, %4, %cst {dimension_numbers = #tpu.dot_dimension_numbers<[1], [0], [0], [1], [0, 0, 1, 1], [], []>} : vector<96x32xf32>, vector<32x4xf32>, vector<96x4xf32> -> vector<96x4xf32>
    %cst_10 = arith.constant dense<0.000000e+00> : vector<16x4xf32>
    %9 = tpu.matmul %3, %8, %cst_10 {dimension_numbers = #tpu.dot_dimension_numbers<[1], [0], [0], [1], [0, 0, 1, 1], [], []>} : vector<16x96xf32>, vector<96x4xf32>, vector<16x4xf32> -> vector<16x4xf32>
    %10 = arith.addf %5, %9 : vector<16x4xf32>
    %c0_11 = arith.constant 0 : index
    %c0_12 = arith.constant 0 : index
    %11 = vector.load %arg6[%c0_11, %c0_12] : memref<16x4xf32, #tpu.memory_space<vmem>>, vector<16x4xf32>
    tpu.vector_store %arg6[%c0_11, %c0_12], %10 {strides = array<i32>} : memref<16x4xf32, #tpu.memory_space<vmem>>, vector<16x4xf32>,
    %c0_13 = arith.constant 0 : index
    %c0_14 = arith.constant 0 : index
    %12 = vector.load %arg7[%c0_13, %c0_14] : memref<16x4xf32, #tpu.memory_space<vmem>>, vector<16x4xf32>
    %c0_15 = arith.constant 0 : index
    %c0_16 = arith.constant 0 : index
    %c0_17 = arith.constant 0 : index
    %c0_18 = arith.constant 0 : index
    %13 = vector.load %arg3[%c0_15, %c0_16, %c0_17, %c0_18] : memref<1x3x32x32xf32, #tpu.memory_space<vmem>>, vector<1x3x32x32xf32>
    %14 = vector.shape_cast %13 : vector<1x3x32x32xf32> to vector<96x32xf32>
    %cst_19 = arith.constant dense<0.000000e+00> : vector<96x4xf32>
    %15 = tpu.matmul %14, %4, %cst_19 {dimension_numbers = #tpu.dot_dimension_numbers<[1], [0], [0], [1], [0, 0, 1, 1], [], []>} : vector<96x32xf32>, vector<32x4xf32>, vector<96x4xf32> -> vector<96x4xf32>
    %cst_20 = arith.constant dense<0.000000e+00> : vector<16x4xf32>
    %16 = tpu.matmul %3, %15, %cst_20 {dimension_numbers = #tpu.dot_dimension_numbers<[1], [0], [0], [1], [0, 0, 1, 1], [], []>} : vector<16x96xf32>, vector<96x4xf32>, vector<16x4xf32> -> vector<16x4xf32>
    %17 = arith.addf %12, %16 : vector<16x4xf32>
    %c0_21 = arith.constant 0 : index
    %c0_22 = arith.constant 0 : index
    %18 = vector.load %arg7[%c0_21, %c0_22] : memref<16x4xf32, #tpu.memory_space<vmem>>, vector<16x4xf32>
    tpu.vector_store %arg7[%c0_21, %c0_22], %17 {strides = array<i32>} : memref<16x4xf32, #tpu.memory_space<vmem>>, vector<16x4xf32>,
    return
  }
  func.func @transform_0(%arg0: i32, %arg1: i32) -> (i32, i32, i32, i32) {
    %c0_i32 = arith.constant 0 : i32
    %c0_i32_0 = arith.constant 0 : i32
    %c0_i32_1 = arith.constant 0 : i32
    return %arg0, %c0_i32, %arg1, %c0_i32_0 : i32, i32, i32, i32
  }
  func.func @transform_1(%arg0: i32, %arg1: i32) -> (i32, i32, i32, i32) {
    %c0_i32 = arith.constant 0 : i32
    %c0_i32_0 = arith.constant 0 : i32
    %c0_i32_1 = arith.constant 0 : i32
    return %arg0, %c0_i32, %arg1, %c0_i32_0 : i32, i32, i32, i32
  }
  func.func @transform_2(%arg0: i32, %arg1: i32) -> (i32, i32) {
    %c0_i32 = arith.constant 0 : i32
    %c0_i32_0 = arith.constant 0 : i32
    %c0_i32_1 = arith.constant 0 : i32
    return %c0_i32, %c0_i32_0 : i32, i32
  }
  func.func @transform_3(%arg0: i32, %arg1: i32) -> (i32, i32) {
    %c0_i32 = arith.constant 0 : i32
    %c0_i32_0 = arith.constant 0 : i32
    %c0_i32_1 = arith.constant 0 : i32
    return %c0_i32, %c0_i32_0 : i32, i32
  }
  func.func @transform_4(%arg0: i32, %arg1: i32) -> (i32, i32) {
    %c0_i32 = arith.constant 0 : i32
    %c0_i32_0 = arith.constant 0 : i32
    return %arg0, %c0_i32 : i32, i32
  }
  func.func @transform_5(%arg0: i32, %arg1: i32) -> (i32, i32) {
    %c0_i32 = arith.constant 0 : i32
    %c0_i32_0 = arith.constant 0 : i32
    return %arg0, %c0_i32 : i32, i32
  }
}

</mosaic_0001>

<bundles_post_ra>
// kernel: piq_model_forward.1
= control target key start
LH: loop header
LB: loop body
LE: loop exit
PB: predicated region body
PF: predicated region fallthrough
CT: control target
= control target key end

     0   :  { %s1966_s0 = inlined_call_operand.hbm [shape: f32[2,3,32,32], index: 0, kind: input, shape index: {}]   ;;  %s1967_s1 = inlined_call_operand.hbm [shape: f32[2,3,32,32], index: 1, kind: input, shape index: {}]   ;;  %s1968_s2 = inlined_call_operand.hbm [shape: f32[16,96], index: 2, kind: input, shape index: {}]   ;;  %s1969_s3 = inlined_call_operand.hbm [shape: f32[32,4], index: 3, kind: input, shape index: {}]   ;;  %s1970_s4 = inlined_call_operand.vmem [shape: f32[32,4], index: 4, kind: output, shape index: {0}]   ;;  %s1971_s5 = inlined_call_operand.vmem [shape: f32[32,4], index: 5, kind: output, shape index: {1}]  }
   0x1   :  { %1980 = sst [smem:[#allocation13_spill]] %s1966_s0 }
   0x2   :  { %11 = vsyncpa [#allocation3], 0 }
   0x3   :  { %13 = vsyncpa [#allocation3 + $0x1], 0 }
   0x4   :  { %14 = vsyncpa [#allocation5], 0 }
   0x5   :  { %16 = vsyncpa [#allocation5 + $0x1], 0 }
   0x6   :  { %17 = vsyncpa [#allocation8], 0  ;;  %s1622_s18 = smov 0   ;;  %s1624_s19 = smov 0  }
   0x7   :  { %s1626_s20 = smov 0   ;;  %s1628_s21 = smov 0  }
   0x8   :  { %s1630_s22 = smov 0   ;;  %s1632_s23 = smov 0  }
   0x9 LB: > { %s1976_s24 = sadd.s32 4294967295, %s1583_s23   ;;  %p57_p0 = scmp.ne.s32.totalorder %s1567_s19, %s1563_s18  ;;  %s1583_s23 = sphi %s1632_s23, %s23_s23   ;;  %s1579_s22 = sphi %s1630_s22, %s1997_s22   ;;  %s1575_s21 = sphi %s1628_s21, %s1996_s21   ;;  %s1571_s20 = sphi %s1626_s20, %s1995_s20   ;;  %s1567_s19 = sphi %s1624_s19, %s1994_s19   ;;  %s1563_s18 = sphi %s1622_s18, %s1993_s18  }
   0xa   : > { %p1654_p1 = scmp.eq.s32.totalorder %s1976_s24, 0  ;;  %p1043_p2 = scmp.ge.s32.totalorder %s1583_s23, 1 }
   0xb   : > { %p190_p3 = scmp.lt.s32.totalorder %s1583_s23, 3  ;;  %s1585_s28 = smov [#allocation6]  }
   0xc   : > { %s1981_s25 = scalar_select %p1654_p1, 1, 0 }
   0xd   : > { %p1662_p4 = por %p1654_p1, %p57_p0  ;;  %p1666_p5 = pnand %p1043_p2, %p190_p3 }
   0xe   : > { %s202_s29 = sshll.u32 %s1585_s28, 4  ;;  %s1586_s6 = smov [#allocation7]   ;;  %s203_s29 = int_to_ptr.vmem [resolvable:$true] %s202_s29 }
   0xf   : > { %s1982_s26 = scalar_select %p1662_p4, 1, 0 }
  0x10   : > { %s1983_s27 = scalar_select %p1666_p5, 1, 0 }
  0x11   : > { %p1333_p6 = pneg %p1666_p5  ;;  %s215_s7 = sshll.u32 %s1586_s6, 4  ;;  %s1678_s7 = int_to_ptr.vmem [resolvable:$true] %s215_s7 }
  0x12   : > { %s1405_s10 = scalar_lea.hbm %s1968_s2, 256 }
  0x13   : > { %p1674_p7 = pnand %p1333_p6, %p1654_p1  ;;  %p1406_p8 = scmp.ne.s32.totalorder %s1968_s2, %s1405_s10 }
  0x14   : > { %p1412_p12 = scmp.lt.u32.totalorder %s1405_s10, %s1968_s2 }
  0x15   : > { %p1407_p9 = pneg %p1674_p7 }
  0x17   : > { %p1408_p10 = pnand %p1407_p9, %p1406_p8 }
  0x19   : > { %p1409_p11 = pneg %p1408_p10 }
  0x1b   : > { %p1414_p13 = pnand %p1412_p12, %p1409_p11 }
  0x1d   : > { %1417 = shalt.err (!%p1414_p13)
}
  0x1e   : > { %s1418_s15 = scalar_lea.vmem %s203_s29, 256  ;;  %p1426_p6 = scmp.lt.s32.totalorder %s203_s29, %s203_s29 }
  0x1f   : > { %p1419_p0 = scmp.ne.s32.totalorder %s203_s29, %s1418_s15  ;;  %p1427_p1 = scmp.lt.s32.totalorder %s1418_s15, %s1418_s15 }
  0x21   : > { %p1421_p2 = pnand %p1419_p0, %p1407_p9  ;;  %p1428_p4 = por %p1427_p1, %p1426_p6 }
  0x23   : > { %p1422_p3 = pneg %p1421_p2 }
  0x25   : > { %p1429_p5 = pnand %p1428_p4, %p1422_p3 }
  0x27   : > { %1432 = shalt.err (!%p1429_p5)
}
  0x28   : > { %s1978_s16 = smov 128   ;;  %s1588_s17 = smov 8  }
  0x29   : > { %1336 = dma.hbm_to_vmem [thread:$0]  (!%p1674_p7), %s1968_s2, 256, %s203_s29, [#allocation5], %s1978_s16, %s1978_s16, %s1588_s17  }
  0x2a   : > { %s1433_s9 = scalar_lea.hbm %s1969_s3, 512 }
  0x2b   : > { %p1434_p1 = scmp.ne.s32.totalorder %s1969_s3, %s1433_s9  ;;  %p1440_p8 = scmp.lt.u32.totalorder %s1433_s9, %s1969_s3 }
  0x2d   : > { %p1436_p4 = pnand %p1434_p1, %p1407_p9 }
  0x2f   : > { %p1437_p5 = pneg %p1436_p4 }
  0x31   : > { %p1442_p10 = pnand %p1440_p8, %p1437_p5 }
  0x33   : > { %1445 = shalt.err (!%p1442_p10)
}
  0x34   : > { %s1446_s29 = scalar_lea.vmem %s1678_s7, 512  ;;  %p1454_p0 = scmp.lt.s32.totalorder %s1678_s7, %s1678_s7 }
  0x35   : > { %p1447_p11 = scmp.ne.s32.totalorder %s1678_s7, %s1446_s29  ;;  %p1455_p2 = scmp.lt.s32.totalorder %s1446_s29, %s1446_s29 }
  0x37   : > { %p1449_p12 = pnand %p1447_p11, %p1407_p9  ;;  %p1456_p3 = por %p1455_p2, %p1454_p0 }
  0x39   : > { %p1450_p13 = pneg %p1449_p12 }
  0x3b   : > { %p1457_p6 = pnand %p1456_p3, %p1450_p13 }
  0x3d   : > { %1460 = shalt.err (!%p1457_p6)
}
  0x3e   : > { %1339 = dma.hbm_to_vmem [thread:$0]  (!%p1674_p7), %s1969_s3, 512, %s1678_s7, [#allocation8], %s1978_s16, %s1978_s16, %s1588_s17  }
  0x3f   : > { %s35_s30 = sadd.s32 1, %s1579_s22  ;;  %s44_s18 = sadd.s32 1, %s1571_s20 }
  0x40   : > { %p37_p9 = scmp.ge.s32.totalorder %s35_s30, 2  ;;  %p51_p1 = scmp.ne.s32.totalorder %s1571_s20, %s1567_s19 }
  0x41   : > { %p52_p4 = scmp.eq.s32.totalorder %s1583_s23, 0  ;;  %p1349_p5 = scmp.lt.s32.totalorder %s1583_s23, 2 }
  0x42   : > { %s1999_s30 = smov (%p37_p9, %s35_s30), 0  ;;  %s229_s28 = sand.u32 1, %s1571_s20  }
  0x43   : > { %p53_p8 = por %p52_p4, %p51_p1  ;;  %s39_s6 = ssub.s32 %s1579_s22, %s1999_s30 }
  0x44   : > { %p42_p10 = scmp.eq.s32.totalorder %s39_s6, 0  ;;  %s1744_s8 = smul.u32 96, %s229_s28 }
  0x45   : > { %s1977_s9 = smul.u32 1536, %s1579_s22  ;;  %p1747_p7 = pnand %p1349_p5, %p53_p8 }
  0x46   : > { %s1752_s10 = scalar_select %p42_p10, %s1571_s20, %s44_s18  }
  0x47   : > { %s1986_s0 = sld [smem:[#allocation13_spill]]  ;;  %s233_s29 = scalar_lea.vmem [#allocation2], %s1744_s8 }
  0x48   : > { %s242_s14 = sshll.u32 %s233_s29, 4  ;;  %s252_s15 = sand.u32 1, %s1583_s23   ;;  %s1762_s14 = int_to_ptr.vmem [resolvable:$true] %s242_s14 }
  0x49   : > { %s1765_s6 = scalar_lea.sflag [#allocation3], %s229_s28  ;;  %p1463_p12 = pneg %p1747_p7 }
  0x4d   : > { %s1759_s13 = scalar_lea.hbm %s1986_s0, %s1977_s9  ;;  %s1466_s12 = scalar_lea.hbm %s1986_s0, 3072 }
  0x4e   : > { %s1461_s24 = scalar_lea.hbm %s1759_s13, 1536  ;;  %p1467_p2 = scmp.lt.u32.totalorder %s1759_s13, %s1986_s0 }
  0x4f   : > { %p1462_p11 = scmp.ne.s32.totalorder %s1759_s13, %s1461_s24  ;;  %p1468_p3 = scmp.lt.u32.totalorder %s1466_s12, %s1461_s24 }
  0x50   : > { %p1470_p9 = scmp.lt.u32.totalorder %s1461_s24, %s1759_s13 }
  0x51   : > { %p1464_p13 = pnand %p1463_p12, %p1462_p11  ;;  %p1469_p6 = por %p1468_p3, %p1467_p2 }
  0x53   : > { %p1465_p0 = pneg %p1464_p13  ;;  %p1471_p1 = por %p1470_p9, %p1469_p6 }
  0x55   : > { %p1472_p4 = pnand %p1471_p1, %p1465_p0 }
  0x57   : > { %1475 = shalt.err (!%p1472_p4)
}
  0x58   : > { %s1476_s28 = scalar_lea.vmem %s1762_s14, 1536  ;;  %s1589_s29 = smov [#allocation2]  }
  0x59   : > { %p1477_p5 = scmp.ne.s32.totalorder %s1762_s14, %s1476_s28  ;;  %s1481_s18 = sshll.u32 %s1589_s29, 4  ;;  %s1482_s18 = int_to_ptr.vmem [resolvable:$false] %s1481_s18 }
  0x5a   : > { %s1483_s16 = scalar_lea.vmem %s1482_s18, 3072  ;;  %p1484_p11 = scmp.lt.s32.totalorder %s1762_s14, %s1482_s18 }
  0x5b   : > { %p1479_p8 = pnand %p1477_p5, %p1463_p12  ;;  %p1485_p13 = scmp.lt.s32.totalorder %s1483_s16, %s1476_s28 }
  0x5d   : > { %p1480_p10 = pneg %p1479_p8  ;;  %p1486_p2 = por %p1485_p13, %p1484_p11 }
  0x5f   : > { %p1487_p3 = pnand %p1486_p2, %p1480_p10 }
  0x61   : > { %1490 = shalt.err (!%p1487_p3)
}
  0x62   : > { %s1987_s24 = smov 128   ;;  %s1988_s9 = smul.u32 1536, %s1579_s22 }
  0x63   : > { %1343 = dma.hbm_to_vmem [thread:$0]  (!%p1747_p7), %s1759_s13, 1536, %s1762_s14, %s1765_s6, %s1987_s24, %s1987_s24, %s1588_s17  }
  0x64   : > { %s1801_s28 = scalar_lea.hbm %s1967_s1, %s1988_s9  ;;  %s256_s29 = scalar_lea.vmem [#allocation4], %s1744_s8 }
  0x65   : > { %s265_s18 = sshll.u32 %s256_s29, 4  ;;  %s1808_s16 = scalar_lea.sflag [#allocation5], %s252_s15  ;;  %s1804_s18 = int_to_ptr.vmem [resolvable:$true] %s265_s18 }
  0x66   : > { %s1491_s0 = scalar_lea.hbm %s1801_s28, 1536  ;;  %s1496_s6 = scalar_lea.hbm %s1967_s1, 3072 }
  0x67   : > { %p1492_p0 = scmp.ne.s32.totalorder %s1801_s28, %s1491_s0  ;;  %p1497_p1 = scmp.lt.u32.totalorder %s1801_s28, %s1967_s1 }
  0x68   : > { %p1498_p4 = scmp.lt.u32.totalorder %s1496_s6, %s1491_s0  ;;  %p1500_p8 = scmp.lt.u32.totalorder %s1491_s0, %s1801_s28 }
  0x69   : > { %p1494_p6 = pnand %p1492_p0, %p1463_p12 }
  0x6a   : > { %p1499_p5 = por %p1498_p4, %p1497_p1 }
  0x6b   : > { %p1495_p9 = pneg %p1494_p6 }
  0x6c   : > { %p1501_p10 = por %p1500_p8, %p1499_p5 }
  0x6e   : > { %p1502_p11 = pnand %p1501_p10, %p1495_p9 }
  0x70   : > { %1505 = shalt.err (!%p1502_p11)
}
  0x71   : > { %s1506_s8 = scalar_lea.vmem %s1804_s18, 1536  ;;  %s1590_s15 = smov [#allocation4]  }
  0x72   : > { %p1507_p13 = scmp.ne.s32.totalorder %s1804_s18, %s1506_s8  ;;  %s1511_s12 = sshll.u32 %s1590_s15, 4  ;;  %s1512_s12 = int_to_ptr.vmem [resolvable:$false] %s1511_s12 }
  0x73   : > { %s1513_s29 = scalar_lea.vmem %s1512_s12, 3072  ;;  %p1514_p0 = scmp.lt.s32.totalorder %s1804_s18, %s1512_s12 }
  0x74   : > { %p1509_p2 = pnand %p1507_p13, %p1463_p12  ;;  %p1515_p6 = scmp.lt.s32.totalorder %s1513_s29, %s1506_s8 }
  0x76   : > { %p1510_p3 = pneg %p1509_p2  ;;  %p1516_p1 = por %p1515_p6, %p1514_p0 }
  0x78   : > { %p1517_p4 = pnand %p1516_p1, %p1510_p3 }
  0x7a   : > { %1520 = shalt.err (!%p1517_p4)
}
  0x7b   : > { %1346 = dma.hbm_to_vmem [thread:$0]  (!%p1747_p7), %s1801_s28, 1536, %s1804_s18, %s1808_s16, %s1987_s24, %s1987_s24, %s1588_s17  }
  0x7c   : > { %p1989_p12 = scmp.ne.s32.totalorder %s1983_s27, 0 }
  0x7d   : > { %s279_s0 = sand.u32 (!%p1989_p12), 1, %s1567_s19   ;;  %p1990_p9 = scmp.ne.s32.totalorder (!%p1989_p12), %s1982_s26, 0 }
  0x7e   : > { %277 = sbr.rel (%p1989_p12) target bundleno = 633 (0x279), region = 36  ;;  %s280_s14 = scalar_lea.sflag (!%p1989_p12), [#allocation3], %s279_s0 }
  0x7f   : > { %s1320_s13 = smul.u32 (!%p1989_p12), 96, %s279_s0 }
  0x81   : > { %s1840_s6 = scalar_lea.vmem (!%p1989_p12), [#allocation2], %s1320_s13 }
  0x85   : > { %1546 = dma.done.wait (%p1990_p9), %s280_s14, 1536  }
  0x86   : > { %1548 = vsyncadd (%p1990_p9), %s280_s14, 4294965760  ;;  %s1991_s7 = sadd.s32 4294967295, %s1583_s23   ;;  %s1848_s24 = scalar_lea.vmem [#allocation4], %s1320_s13 }
  0x87   : > { %s288_s9 = sand.u32 1, %s1991_s7  }
  0x88   : > { %s289_s17 = scalar_lea.sflag [#allocation5], %s288_s9 }
  0x89   : > { %1550 = dma.done.wait (%p1990_p9), %s289_s17, 1536  }
  0x8a   : > { %1552 = vsyncadd (%p1990_p9), %s289_s17, 4294965760  ;;  %p1992_p7 = scmp.ne.s32.totalorder %s1981_s25, 0 }
  0x8c   : > { %1554 = dma.done.wait (%p1992_p7), [#allocation5], 256  }
  0x8d   : > { %1556 = vsyncadd (%p1992_p7), [#allocation5], 4294967040 }
  0x8e   : > { %1558 = dma.done.wait (%p1992_p7), [#allocation8], 512  }
  0x8f   : > { %1560 = vsyncadd (%p1992_p7), [#allocation8], 4294966784  ;;  %vm380_vm0 = vcmask 261120   ;;  %v362_v0 = vld [vmem:[#allocation7] sm:$0xff]  ;;  %v363_v1 = vld [vmem:[#allocation7 + $0x8] sm:$0xff]  ;;  %vm542_vm1 = vcmask 785408  }
  0x90   : > { %v364_v2 = vld [vmem:[#allocation7 + $0x10] sm:$0xff]  ;;  %v1252_v3 = vpack.c.bf16 %v363_v1, %v362_v0  ;;  %v365_v4 = vld [vmem:[#allocation7 + $0x18] sm:$0xff]  ;;  %v370_v8 = vld [vmem:[%s1840_s6 + $0x10] sm:$0xff]  ;;  %s1052_s25 = sshll.u32 %s1575_s21, 1  ;;  %vm355_vm2 = vcmask 31744   ;;  %v1591_v31 = vmov 0.0  }
  0x91   : > { %v368_v5 = vld [vmem:[%s1840_s6] sm:$0xff]  ;;  %v1256_v6 = vpack.c.bf16 %v365_v4, %v364_v2  ;;  %v369_v7 = vld [vmem:[%s1840_s6 + $0x8] sm:$0xff]  ;;  %v371_v9 = vld [vmem:[%s1840_s6 + $0x18] sm:$0xff]  ;;  %p340_p5 = scmp.lt.s32.totalorder %s1052_s25, 3 }
  0x92   : > { %1154 = vmatprep.mubr.msk.f32.mxu0 %vm380_vm0, %v368_v5  ;;  %1253 = vmatprep.subr.bf16.mxu0 %v1252_v3  ;;  %v372_v10 = vld [vmem:[%s1840_s6 + $0x20] sm:$0xff]  ;;  %v373_v11 = vld [vmem:[%s1840_s6 + $0x28] sm:$0xff]  ;;  %v374_v12 = vld [vmem:[%s1840_s6 + $0x30] sm:$0xff] }
  0x93   : > { %1255 = vmatpush3.bf16.msra.mxu0 %v1252_v3  ;;  %v375_v13 = vld [vmem:[%s1840_s6 + $0x38] sm:$0xff]  ;;  %v376_v14 = vld [vmem:[%s1840_s6 + $0x40] sm:$0xff]  ;;  %v377_v15 = vld [vmem:[%s1840_s6 + $0x48] sm:$0xff]  ;;  %s2001_s25 = smov (!%p340_p5, %s1052_s25), 3 }
  0x94   : > { %1257 = vmatprep.subr.bf16.mxu0 %v1256_v6  ;;  %v378_v16 = vld [vmem:[%s1840_s6 + $0x50] sm:$0xff]  ;;  %v379_v17 = vld [vmem:[%s1840_s6 + $0x58] sm:$0xff]  ;;  %v631_v18 = vld [vmem:[%s1848_s24] sm:$0xff]  ;;  %s1053_s26 = sshll.u32 %s2001_s25, 3 }
  0x95   : > { %v632_v19 = vld [vmem:[%s1848_s24 + $0x8] sm:$0xff]  ;;  %v633_v20 = vld [vmem:[%s1848_s24 + $0x10] sm:$0xff]  ;;  %v634_v21 = vld [vmem:[%s1848_s24 + $0x18] sm:$0xff]  ;;  %s1920_s18 = scalar_lea.vmem %s1970_s4, %s1053_s26  ;;  %s349_s11 = scalar_lea.vmem %s1971_s5, %s1053_s26 }
  0x96   : > { %v635_v22 = vld [vmem:[%s1848_s24 + $0x20] sm:$0xff]  ;;  %v636_v23 = vld [vmem:[%s1848_s24 + $0x28] sm:$0xff]  ;;  %v637_v24 = vld [vmem:[%s1848_s24 + $0x30] sm:$0xff]  ;;  %356 = vst.msk [vmem:[%s1920_s18] sm:$0xff] %vm355_vm2, %v1591_v31 }
  0x97   : > { %1259 = vmatpush3.bf16.msra.mxu0 %v1256_v6  ;;  %v638_v25 = vld [vmem:[%s1848_s24 + $0x38] sm:$0xff]  ;;  %v639_v26 = vld [vmem:[%s1848_s24 + $0x40] sm:$0xff]  ;;  %v640_v27 = vld [vmem:[%s1848_s24 + $0x48] sm:$0xff]  ;;  %357 = vst.msk [vmem:[%s1920_s18 + $0x8] sm:$0xff] %vm355_vm2, %v1591_v31 }
  0x98   : > { %1285 = vmatprep.subr.bf16.mxu0 %v1252_v3  ;;  %v641_v28 = vld [vmem:[%s1848_s24 + $0x50] sm:$0xff]  ;;  %v642_v29 = vld [vmem:[%s1848_s24 + $0x58] sm:$0xff]  ;;  %v360_v30 = vld [vmem:[#allocation6] sm:$0xff]  ;;  %358 = vst.msk [vmem:[%s349_s11] sm:$0xff] %vm355_vm2, %v1591_v31 }
  0x99   : > { %1196 = vmatprep.mubr.msk.f32.mxu1 %vm542_vm1, %v360_v30  ;;  %v361_v52 = vld [vmem:[#allocation6 + $0x8] sm:$0xff]  ;;  %359 = vst.msk [vmem:[%s349_s11 + $0x8] sm:$0xff] %vm355_vm2, %v1591_v31 }
  0x9a   : > { %1155 = vmatmul.mubr.msk.f32.vlgmr.msra.gmra.mrb[0].mxu0 %vm380_vm0, %v369_v7 }
  0x9b   : > { %1287 = vmatpush3.bf16.msra.mxu0 %v1252_v3  ;;  %1157 = vmatprep.mubr.msk.f32.mxu0 %vm380_vm0, %v370_v8 }
  0x9c   : > { %1289 = vmatprep.subr.bf16.mxu0 %v1256_v6 }
  0x9e   : > { %1158 = vmatmul.mubr.msk.f32.gmra.mrb[2].mxu0 %vm380_vm0, %v371_v9  ;;  %v367_v5 = vld [vmem:[%s1920_s18 + $0x8] sm:$0xff] }
  0x9f   : > { %1160 = vmatprep.mubr.msk.f32.mxu0 %vm380_vm0, %v372_v10  ;;  %1291 = vmatpush3.bf16.msra.mxu0 %v1256_v6  ;;  %v366_v6 = vld [vmem:[%s1920_s18] sm:$0xff] }
  0xa2   : > { %1161 = vmatmul.mubr.msk.f32.gmra.mrb[4].mxu0 %vm380_vm0, %v373_v11  ;;  %v629_v11 = vld [vmem:[%s349_s11] sm:$0xff] }
  0xa3   : > { %1163 = vmatprep.mubr.msk.f32.mxu0 %vm380_vm0, %v374_v12  ;;  %v630_v12 = vld [vmem:[%s349_s11 + $0x8] sm:$0xff] }
  0xa6   : > { %1164 = vmatmul.mubr.msk.f32.gmra.mrb[6].mxu0 %vm380_vm0, %v375_v13 }
  0xa7   : > { %1166 = vmatprep.mubr.msk.f32.mxu0 %vm380_vm0, %v376_v14 }
  0xaa   : > { %1167 = vmatmul.mubr.msk.f32.gmra.mrb[8].mxu0 %vm380_vm0, %v377_v15 }
  0xab   : > { %1169 = vmatprep.mubr.msk.f32.mxu0 %vm380_vm0, %v378_v16 }
  0xae   : > { %1170 = vmatmul.mubr.msk.f32.gmra.mrb[10].mxu0 %vm380_vm0, %v379_v17 }
  0xaf   : > { %1207 = vmatprep.mubr.msk.f32.mxu0 %vm380_vm0, %v631_v18 }
  0xb2   : > { %1208 = vmatmul.mubr.msk.f32.vlgmr.msra.gmra.mrb[12].mxu0 %vm380_vm0, %v632_v19 }
  0xb3   : > { %1210 = vmatprep.mubr.msk.f32.mxu0 %vm380_vm0, %v633_v20 }
  0xb6   : > { %1211 = vmatmul.mubr.msk.f32.gmra.mrb[14].mxu0 %vm380_vm0, %v634_v21 }
  0xb7   : > { %1213 = vmatprep.mubr.msk.f32.mxu0 %vm380_vm0, %v635_v22 }
  0xba   : > { %1214 = vmatmul.mubr.msk.f32.gmra.mrb[16].mxu0 %vm380_vm0, %v636_v23 }
  0xbb   : > { %1216 = vmatprep.mubr.msk.f32.mxu0 %vm380_vm0, %v637_v24 }
  0xbe   : > { %1217 = vmatmul.mubr.msk.f32.gmra.mrb[18].mxu0 %vm380_vm0, %v638_v25 }
  0xbf   : > { %1219 = vmatprep.mubr.msk.f32.mxu0 %vm380_vm0, %v639_v26 }
  0xc2   : > { %1220 = vmatmul.mubr.msk.f32.gmra.mrb[20].mxu0 %vm380_vm0, %v640_v27 }
  0xc3   : > { %1222 = vmatprep.mubr.msk.f32.mxu0 %vm380_vm0, %v641_v28 }
  0xc6   : > { %1223 = vmatmul.mubr.msk.f32.gmra.mrb[22].mxu0 %vm380_vm0, %v642_v29 }
 0x16d   : > { %v1156_v32 = vpop.f32.mrb[0].mxu0 }
 0x16e   : > { %v483_v33 = vpop.f32.mrb[1].mxu0 }
 0x16f   : > { %v1260_v34 = vpack.c.bf16 %v1156_v32, %v483_v33 }
 0x171   : > { %v1159_v35 = vpop.f32.mrb[2].mxu0  ;;  %1261 = vmatprep.subr.bf16.mxu1 %v1260_v34 }
 0x172   : > { %v493_v36 = vpop.f32.mrb[3].mxu0  ;;  %1263 = vmatpush3.bf16.msra.mxu1 %v1260_v34 }
 0x173   : > { %v1264_v37 = vpack.c.bf16 %v1159_v35, %v493_v36 }
 0x175   : > { %v1162_v38 = vpop.f32.mrb[4].mxu0  ;;  %1265 = vmatprep.subr.bf16.mxu1 %v1264_v37 }
 0x176   : > { %v503_v39 = vpop.f32.mrb[5].mxu0  ;;  %1267 = vmatpush3.bf16.msra.mxu1 %v1264_v37 }
 0x177   : > { %v1268_v40 = vpack.c.bf16 %v1162_v38, %v503_v39 }
 0x179   : > { %v1165_v41 = vpop.f32.mrb[6].mxu0  ;;  %1269 = vmatprep.subr.bf16.mxu1 %v1268_v40 }
 0x17a   : > { %v513_v42 = vpop.f32.mrb[7].mxu0  ;;  %1271 = vmatpush3.bf16.msra.mxu1 %v1268_v40 }
 0x17b   : > { %v1272_v43 = vpack.c.bf16 %v1165_v41, %v513_v42 }
 0x17d   : > { %v1168_v44 = vpop.f32.mrb[8].mxu0  ;;  %1273 = vmatprep.subr.bf16.mxu1 %v1272_v43 }
 0x17e   : > { %v523_v45 = vpop.f32.mrb[9].mxu0  ;;  %1275 = vmatpush3.bf16.msra.mxu1 %v1272_v43 }
 0x17f   : > { %v1276_v46 = vpack.c.bf16 %v1168_v44, %v523_v45 }
 0x181   : > { %v1171_v47 = vpop.f32.mrb[10].mxu0  ;;  %1277 = vmatprep.subr.bf16.mxu1 %v1276_v46 }
 0x182   : > { %v533_v48 = vpop.f32.mrb[11].mxu0  ;;  %1279 = vmatpush3.bf16.msra.mxu1 %v1276_v46 }
 0x183   : > { %v1280_v49 = vpack.c.bf16 %v1171_v47, %v533_v48 }
 0x185   : > { %1281 = vmatprep.subr.bf16.mxu1 %v1280_v49  ;;  %v1209_v50 = vpop.f32.mrb[12].mxu0 }
 0x186   : > { %1283 = vmatpush3.bf16.msra.mxu1 %v1280_v49  ;;  %v745_v51 = vpop.f32.mrb[13].mxu0 }
 0x187   : > { %v1292_v53 = vpack.c.bf16 %v1209_v50, %v745_v51 }
 0x189   : > { %1197 = vmatmul.mubr.msk.f32.vlgmr.msra.gmra.mrb[0].mxu1 %vm542_vm1, %v361_v52  ;;  %v1212_v54 = vpop.f32.mrb[14].mxu0  ;;  %1293 = vmatprep.subr.bf16.mxu1 %v1292_v53 }
 0x18a   : > { %v755_v55 = vpop.f32.mrb[15].mxu0  ;;  %1295 = vmatpush3.bf16.msra.mxu1 %v1292_v53  ;;  %1249 = vmatprep.mubr.msk.f32.mxu1 %vm542_vm1, %v360_v30 }
 0x18b   : > { %v1296_v56 = vpack.c.bf16 %v1212_v54, %v755_v55 }
 0x18d   : > { %v1215_v57 = vpop.f32.mrb[16].mxu0  ;;  %1297 = vmatprep.subr.bf16.mxu1 %v1296_v56 }
 0x18e   : > { %v765_v58 = vpop.f32.mrb[17].mxu0  ;;  %1299 = vmatpush3.bf16.msra.mxu1 %v1296_v56 }
 0x18f   : > { %v1300_v59 = vpack.c.bf16 %v1215_v57, %v765_v58 }
 0x191   : > { %v1218_v60 = vpop.f32.mrb[18].mxu0  ;;  %1301 = vmatprep.subr.bf16.mxu1 %v1300_v59 }
 0x192   : > { %v775_v61 = vpop.f32.mrb[19].mxu0  ;;  %1303 = vmatpush3.bf16.msra.mxu1 %v1300_v59 }
 0x193   : > { %v1304_v62 = vpack.c.bf16 %v1218_v60, %v775_v61 }
 0x195   : > { %v1221_v63 = vpop.f32.mrb[20].mxu0  ;;  %1305 = vmatprep.subr.bf16.mxu1 %v1304_v62 }
 0x196   : > { %v785_v0 = vpop.f32.mrb[21].mxu0  ;;  %1307 = vmatpush3.bf16.msra.mxu1 %v1304_v62 }
 0x197   : > { %v1308_v1 = vpack.c.bf16 %v1221_v63, %v785_v0 }
 0x199   : > { %v1224_v2 = vpop.f32.mrb[22].mxu0  ;;  %1309 = vmatprep.subr.bf16.mxu1 %v1308_v1 }
 0x19a   : > { %v795_v3 = vpop.f32.mrb[23].mxu0  ;;  %1311 = vmatpush3.bf16.msra.mxu1 %v1308_v1 }
 0x19b   : > { %v1312_v4 = vpack.c.bf16 %v1224_v2, %v795_v3 }
 0x19d   : > { %1313 = vmatprep.subr.bf16.mxu1 %v1312_v4 }
 0x19e   : > { %1315 = vmatpush3.bf16.msra.mxu1 %v1312_v4 }
 0x1a1   : > { %1250 = vmatmul.mubr.msk.f32.vlgmr.msra.gmra.mrb[2].mxu1 %vm542_vm1, %v361_v52 }
 0x25c   : > { %v1198_v7 = vpop.f32.mrb[0].mxu1 }
 0x25d   : > { %v625_v8 = vadd.f32 %v1198_v7, %v367_v5  ;;  %v615_v9 = vpop.f32.mrb[1].mxu1 }
 0x25e   : > { %v624_v10 = vadd.f32 %v615_v9, %v366_v6 }
 0x25f   : > { %628 = vst.msk [vmem:[%s1920_s18 + $0x8] sm:$0xff] %vm355_vm2, %v625_v8 }
 0x260   : > { %627 = vst.msk [vmem:[%s1920_s18] sm:$0xff] %vm355_vm2, %v624_v10 }
 0x274   : > { %v1251_v13 = vpop.f32.mrb[2].mxu1 }
 0x275   : > { %v870_v14 = vpop.f32.mrb[3].mxu1  ;;  %v880_v16 = vadd.f32 %v1251_v13, %v630_v12 }
 0x276   : > { %v879_v15 = vadd.f32 %v870_v14, %v629_v11 }
 0x277   : > { %882 = vst.msk [vmem:[%s349_s11 + $0x8] sm:$0xff] %vm355_vm2, %v880_v16 }
 0x278   : > { %881 = vst.msk [vmem:[%s349_s11] sm:$0xff] %vm355_vm2, %v879_v15 }
 0x279 PF: > { %s23_s23 = sadd.s32 1, %s1583_s23   ;;  %s1993_s18 = smov %s1567_s19 }
 0x27a   : > { %p20_p8 = scmp.ge.s32.totalorder %s23_s23, 4   ;;  %s1994_s19 = smov %s1571_s20 }
 0x27b   : > { %s1995_s20 = smov %s1752_s10  ;;  %s1996_s21 = smov %s1579_s22 }
 0x27c   : > { %s1997_s22 = smov %s1999_s30  ;;  %22 = sbr.rel (!%p20_p8) target bundleno = 9 (0x9), region = 113 }
 0x283   :  { %922 = vsyncpa [#allocation3], 1 }
 0x284   :  { %924 = vsyncpa [#allocation3 + $0x1], 1 }
 0x285   :  { %925 = vsyncpa [#allocation5], 1 }
 0x286   :  { %927 = vsyncpa [#allocation5 + $0x1], 1 }
 0x287   :  { %928 = vsyncpa [#allocation8], 1 }

</bundles_post_ra>
